<compile_context>
chip_gen: v7x
topology: tpu7x:2x2x1
jax: 0.10.0
libtpu: 0.0.40
codegen_flags: <defaults>
</compile_context>

<pallas_src>
import functools

import jax
import jax.numpy as jnp
from jax.experimental import pallas as pl
from jax.experimental.pallas import tpu as pltpu


def _simple_retention_kernel(x_ref, w_ref, o_ref, *, gamma):
    # One grid step handles a (tm, H) tile of X against the full (H, H) weight.
    x = x_ref[...]
    y = jnp.dot(x, w_ref[...], preferred_element_type=jnp.float32)  # MXU matmul
    out = x.astype(jnp.float32) + gamma * jnp.tanh(y)               # VPU + EUP
    o_ref[...] = out.astype(o_ref.dtype)


def _round_up(x, m):
    return ((x + m - 1) // m) * m


def simple_retentions(x, w_r, gamma, *, tm=1024):
    """x: (B, S, H), w_r: (H, H), gamma: python float.

    tm: row tile (rows of flattened X per grid step). Default 1024 sits on the
    HBM roofline plateau and fits comfortably in scoped VMEM on v5e/v6e/v7x
    (~2 MiB of double-buffered tiles + 64 KiB resident W_R).
    """
    B, S, H = x.shape
    M = B * S
    x2d = x.reshape(M, H)

    # --- tile-size / grid selection (no divisibility requirement) ----------
    tm = int(min(tm, _round_up(M, 8)))     # don't over-allocate for tiny M
    tm = max(tm, 8)                        # sublane minimum
    n_steps = pl.cdiv(M, tm)
    # Keep >=2 grid steps on large problems so v7x's two TensorCores both work.
    if n_steps < 2 and M > 1024:
        tm = _round_up(pl.cdiv(M, 2), 8)
        n_steps = pl.cdiv(M, tm)

    M_pad = n_steps * tm
    if M_pad != M:
        # Zero-pad the trailing rows; they compute harmless values and are
        # sliced off below.
        x2d = jnp.pad(x2d, ((0, M_pad - M), (0, 0)))

    kernel = functools.partial(_simple_retention_kernel, gamma=float(gamma))

    out2d = pl.pallas_call(
        kernel,
        out_shape=jax.ShapeDtypeStruct((M_pad, H), x.dtype),
        grid_spec=pltpu.PrefetchScalarGridSpec(
            num_scalar_prefetch=0,
            grid=(n_steps,),
            in_specs=[
                # Streaming X row-tile, default double-buffered pipelining.
                pl.BlockSpec((tm, H), lambda i: (i, 0)),
                # W_R is grid-invariant: keep it resident and single-buffered
                # (saves one redundant pipeline buffer + warm-up DMA).
                pl.BlockSpec((H, H), lambda i: (0, 0),
                             pipeline_mode=pl.Buffered(1)),
            ],
            out_specs=pl.BlockSpec((tm, H), lambda i: (i, 0)),
        ),
        compiler_params=pltpu.CompilerParams(
            dimension_semantics=("parallel",),   # megacore-shardable row axis
            vmem_limit_bytes=32 << 20,           # headroom for larger tm sweeps
        ),
    )(x2d, w_r)

    if M_pad != M:
        out2d = out2d[:M]
    return out2d.reshape(B, S, H)


if __name__ == "__main__":
    hidden_size = 128
    gamma = 0.96875
    B, S = 2, 8

    key = jax.random.PRNGKey(0)
    k_x, k_w = jax.random.split(key)
    x = jax.random.normal(k_x, (B, S, hidden_size), dtype=jnp.float32)
    # torch.randn(H, H) / H  -> deterministic synthetic init
    w_r = (jax.random.normal(k_w, (hidden_size, hidden_size), dtype=jnp.float32)
           / hidden_size)

    out = simple_retentions(x, w_r, gamma)
    out = jax.block_until_ready(out)

    # Pure-JAX reference check
    ref = x + gamma * jnp.tanh(jnp.einsum("bsh,hk->bsk", x, w_r))
    assert out.shape == (B, S, hidden_size)
    assert jnp.allclose(out, ref, atol=1e-5, rtol=1e-5)

    print("KERNEL_OK")
</pallas_src>

<mosaic_0001>
module attributes {stable_mosaic.version = 11 : i64} {
  func.func @_simple_retention_kernel(%arg0: i32, %arg1: memref<16x128xf32, #tpu.memory_space<vmem>>, %arg2: memref<128x128xf32, #tpu.memory_space<vmem>>, %arg3: memref<16x128xf32, #tpu.memory_space<vmem>>) attributes {dimension_semantics = [#tpu.dimension_semantics<parallel>], iteration_bounds = array<i64: 1>, scalar_prefetch = 0 : i64, scratch_operands = 0 : i64, tpu.core_type = #tpu.core_type<tc>, window_params = [{transform_indices = @transform_0, window_bounds = array<i64: 16, 128>}, {pipeline_mode = #tpu.pipeline_mode<synchronous>, transform_indices = @transform_1, window_bounds = array<i64: 128, 128>}, {transform_indices = @transform_2, window_bounds = array<i64: 16, 128>}]} {
    %c0 = arith.constant 0 : index
    %c0_0 = arith.constant 0 : index
    %0 = vector.load %arg1[%c0, %c0_0] : memref<16x128xf32, #tpu.memory_space<vmem>>, vector<16x128xf32>
    %c0_1 = arith.constant 0 : index
    %c0_2 = arith.constant 0 : index
    %1 = vector.load %arg2[%c0_1, %c0_2] : memref<128x128xf32, #tpu.memory_space<vmem>>, vector<128x128xf32>
    %cst = arith.constant dense<0.000000e+00> : vector<16x128xf32>
    %2 = tpu.matmul %0, %1, %cst {dimension_numbers = #tpu.dot_dimension_numbers<[1], [0], [0], [1], [0, 0, 1, 1], [], []>} : vector<16x128xf32>, vector<128x128xf32>, vector<16x128xf32> -> vector<16x128xf32>
    %3 = math.tanh %2 : vector<16x128xf32>
    %cst_3 = arith.constant 9.687500e-01 : f32
    %4 = vector.broadcast %cst_3 : f32 to vector<16x128xf32>
    %5 = arith.mulf %4, %3 : vector<16x128xf32>
    %6 = arith.addf %0, %5 : vector<16x128xf32>
    %c0_4 = arith.constant 0 : index
    %c0_5 = arith.constant 0 : index
    %7 = vector.load %arg3[%c0_4, %c0_5] : memref<16x128xf32, #tpu.memory_space<vmem>>, vector<16x128xf32>
    tpu.vector_store %arg3[%c0_4, %c0_5], %6 {strides = array<i32>} : memref<16x128xf32, #tpu.memory_space<vmem>>, vector<16x128xf32>,
    return
  }
  func.func @transform_0(%arg0: i32) -> (i32, i32) {
    %c0_i32 = arith.constant 0 : i32
    %c0_i32_0 = arith.constant 0 : i32
    return %arg0, %c0_i32 : i32, i32
  }
  func.func @transform_1(%arg0: i32) -> (i32, i32) {
    %c0_i32 = arith.constant 0 : i32
    %c0_i32_0 = arith.constant 0 : i32
    %c0_i32_1 = arith.constant 0 : i32
    return %c0_i32, %c0_i32_0 : i32, i32
  }
  func.func @transform_2(%arg0: i32) -> (i32, i32) {
    %c0_i32 = arith.constant 0 : i32
    %c0_i32_0 = arith.constant 0 : i32
    return %arg0, %c0_i32 : i32, i32
  }
}

</mosaic_0001>

<bundles_post_ra>
// kernel: tpu_custom_call.1
= control target key start
LH: loop header
LB: loop body
LE: loop exit
PB: predicated region body
PF: predicated region fallthrough
CT: control target
= control target key end

     0   :  { %7 = vsyncpa [#allocation3], 0  ;;  %s390_s0 = inlined_call_operand.hbm [shape: f32[16,128], index: 0, kind: input, shape index: {}]   ;;  %s391_s1 = inlined_call_operand.hbm [shape: f32[128,128], index: 1, kind: input, shape index: {}]   ;;  %s392_s2 = inlined_call_operand.hbm [shape: f32[16,128], index: 2, kind: output, shape index: {}]  }
   0x1   :  { %8 = vsyncpa [#allocation6], 0 }
   0x2   :  { %9 = vsyncpa [#allocation4], 0  ;;  %s325_s9 = smov [#allocation2]   ;;  %s253_s13 = scalar_lea.hbm %s390_s0, 256 }
   0x3   :  { %s15_s10 = sshll.u32 %s325_s9, 4  ;;  %p254_p0 = scmp.ne.s32.totalorder %s390_s0, %s253_s13  ;;  %s16_s10 = int_to_ptr.vmem [resolvable:$true] %s15_s10 }
   0x4   :  { %p257_p1 = scmp.lt.u32.totalorder %s253_s13, %s390_s0 }
   0x6   :  { %p259_p2 = pnand %p257_p1, %p254_p0 }
   0x8   :  { %262 = shalt.err (!%p259_p2)
}
   0x9   :  { %s263_s18 = scalar_lea.vmem %s16_s10, 256  ;;  %p268_p4 = scmp.lt.s32.totalorder %s16_s10, %s16_s10 }
   0xa   :  { %p264_p3 = scmp.ne.s32.totalorder %s16_s10, %s263_s18  ;;  %p269_p5 = scmp.lt.s32.totalorder %s263_s18, %s263_s18 }
   0xc   :  { %p270_p6 = por %p269_p5, %p268_p4 }
   0xe   :  { %p271_p7 = pnand %p270_p6, %p264_p3 }
  0x10   :  { %274 = shalt.err (!%p271_p7)
}
  0x11   :  { %s326_s19 = smov 128   ;;  %s327_s20 = smov 8  }
  0x12   :  { %21 = dma.hbm_to_vmem [thread:$0]  %s390_s0, 256, %s16_s10, [#allocation3], %s326_s19, %s326_s19, %s327_s20  }
  0x13   :  { %s328_s23 = smov [#allocation5]   ;;  %s275_s27 = scalar_lea.hbm %s391_s1, 2048 }
  0x14   :  { %s27_s24 = sshll.u32 %s328_s23, 4  ;;  %p276_p8 = scmp.ne.s32.totalorder %s391_s1, %s275_s27  ;;  %s28_s24 = int_to_ptr.vmem [resolvable:$true] %s27_s24 }
  0x15   :  { %p279_p9 = scmp.lt.u32.totalorder %s275_s27, %s391_s1 }
  0x17   :  { %p281_p10 = pnand %p279_p9, %p276_p8 }
  0x19   :  { %284 = shalt.err (!%p281_p10)
}
  0x1a   :  { %s285_s4 = scalar_lea.vmem %s28_s24, 2048  ;;  %p290_p12 = scmp.lt.s32.totalorder %s28_s24, %s28_s24 }
  0x1b   :  { %p286_p11 = scmp.ne.s32.totalorder %s28_s24, %s285_s4  ;;  %p291_p13 = scmp.lt.s32.totalorder %s285_s4, %s285_s4 }
  0x1d   :  { %p292_p0 = por %p291_p13, %p290_p12 }
  0x1f   :  { %p293_p1 = pnand %p292_p0, %p286_p11 }
  0x21   :  { %296 = shalt.err (!%p293_p1)
}
  0x22   :  { %33 = dma.hbm_to_vmem [thread:$0]  %s391_s1, 2048, %s28_s24, [#allocation6], %s326_s19, %s326_s19, %s327_s20  }
  0x23   :  { %319 = dma.done.wait [#allocation3], 256  }
  0x24   :  { %320 = vsyncadd [#allocation3], 4294967040 }
  0x25   :  { %321 = dma.done.wait [#allocation6], 2048  }
  0x26   :  { %322 = vsyncadd [#allocation6], 4294965248  ;;  %v42_v0 = vld [vmem:[#allocation5] sm:$0xff]  ;;  %v43_v1 = vld [vmem:[#allocation5 + $0x8] sm:$0xff]  ;;  %s329_s1 = smov [#allocation7]  }
  0x27   :  { %v44_v2 = vld [vmem:[#allocation5 + $0x10] sm:$0xff]  ;;  %v212_v3 = vpack.c.bf16 %v43_v1, %v42_v0  ;;  %v45_v4 = vld [vmem:[#allocation5 + $0x18] sm:$0xff]  ;;  %v46_v6 = vld [vmem:[#allocation5 + $0x20] sm:$0xff]  ;;  %s146_s6 = sshll.u32 %s329_s1, 4  ;;  %s147_s6 = int_to_ptr.vmem [resolvable:$true] %s146_s6 }
  0x28   :  { %v216_v5 = vpack.c.bf16 %v45_v4, %v44_v2  ;;  %v47_v7 = vld [vmem:[#allocation5 + $0x28] sm:$0xff]  ;;  %v40_v9 = vld [vmem:[#allocation2] sm:$0xff]  ;;  %v49_v11 = vld [vmem:[#allocation5 + $0x38] sm:$0xff]  ;;  %s297_s7 = scalar_lea.vmem %s147_s6, 256  ;;  %p302_p3 = scmp.lt.s32.totalorder %s147_s6, %s147_s6 }
  0x29   :  { %213 = vmatprep.subr.bf16.mxu0 %v212_v3  ;;  %v220_v8 = vpack.c.bf16 %v47_v7, %v46_v6  ;;  %v48_v10 = vld [vmem:[#allocation5 + $0x30] sm:$0xff]  ;;  %209 = vmatprep.mubr.f32.mxu0 %v40_v9  ;;  %v50_v13 = vld [vmem:[#allocation5 + $0x40] sm:$0xff]  ;;  %v51_v14 = vld [vmem:[#allocation5 + $0x48] sm:$0xff]  ;;  %p298_p2 = scmp.ne.s32.totalorder %s147_s6, %s297_s7  ;;  %p303_p4 = scmp.lt.s32.totalorder %s297_s7, %s297_s7 }
  0x2a   :  { %215 = vmatpush3.bf16.msra.mxu0 %v212_v3  ;;  %v224_v12 = vpack.c.bf16 %v49_v11, %v48_v10  ;;  %v228_v15 = vpack.c.bf16 %v51_v14, %v50_v13  ;;  %v52_v16 = vld [vmem:[#allocation5 + $0x50] sm:$0xff]  ;;  %v53_v17 = vld [vmem:[#allocation5 + $0x58] sm:$0xff]  ;;  %v54_v19 = vld [vmem:[#allocation5 + $0x60] sm:$0xff] }
  0x2b   :  { %217 = vmatprep.subr.bf16.mxu0 %v216_v5  ;;  %v232_v18 = vpack.c.bf16 %v53_v17, %v52_v16  ;;  %v55_v20 = vld [vmem:[#allocation5 + $0x68] sm:$0xff]  ;;  %v56_v22 = vld [vmem:[#allocation5 + $0x70] sm:$0xff]  ;;  %v57_v23 = vld [vmem:[#allocation5 + $0x78] sm:$0xff]  ;;  %p304_p5 = por %p303_p4, %p302_p3 }
  0x2c   :  { %v236_v21 = vpack.c.bf16 %v55_v20, %v54_v19  ;;  %v240_v24 = vpack.c.bf16 %v57_v23, %v56_v22  ;;  %v41_v25 = vld [vmem:[#allocation2 + $0x8] sm:$0xff] }
  0x2d   :  { %p305_p6 = pnand %p304_p5, %p298_p2 }
  0x2e   :  { %219 = vmatpush3.bf16.msra.mxu0 %v216_v5 }
  0x2f   :  { %221 = vmatprep.subr.bf16.mxu0 %v220_v8 }
  0x32   :  { %223 = vmatpush3.bf16.msra.mxu0 %v220_v8 }
  0x33   :  { %225 = vmatprep.subr.bf16.mxu0 %v224_v12 }
  0x36   :  { %227 = vmatpush3.bf16.msra.mxu0 %v224_v12 }
  0x37   :  { %229 = vmatprep.subr.bf16.mxu0 %v228_v15 }
  0x3a   :  { %231 = vmatpush3.bf16.msra.mxu0 %v228_v15 }
  0x3b   :  { %233 = vmatprep.subr.bf16.mxu0 %v232_v18 }
  0x3e   :  { %235 = vmatpush3.bf16.msra.mxu0 %v232_v18 }
  0x3f   :  { %237 = vmatprep.subr.bf16.mxu0 %v236_v21 }
  0x42   :  { %239 = vmatpush3.bf16.msra.mxu0 %v236_v21 }
  0x43   :  { %241 = vmatprep.subr.bf16.mxu0 %v240_v24 }
  0x46   :  { %243 = vmatpush3.bf16.msra.mxu0 %v240_v24 }
  0x49   :  { %210 = vmatmul.mubr.f32.vlgmr.msra.gmra.mrb[0].mxu0 %v41_v25 }
 0x11c   :  { %v211_v26 = vpop.f32.mrb[0].mxu0 }
 0x11d   :  { %249 = vtanh.f32 %v211_v26  ;;  %v124_v27 = vpop.f32.mrb[1].mxu0 }
 0x11e   :  { %251 = vtanh.f32 %v124_v27 }
 0x127   :  { %v250_v28 = vpop.eup %249 }
 0x128   :  { %v252_v29 = vpop.eup %251  ;;  %v136_v30 = vmul.f32 0.96875, %v250_v28 }
 0x129   :  { %v135_v31 = vmul.f32 0.96875, %v252_v29 }
 0x12a   :  { %v138_v32 = vadd.f32 %v136_v30, %v41_v25 }
 0x12b   :  { %v137_v33 = vadd.f32 %v135_v31, %v40_v9 }
 0x12c   :  { %140 = vst [vmem:[#allocation7 + $0x8] sm:$0xff] %v138_v32 }
 0x12d   :  { %139 = vst [vmem:[#allocation7] sm:$0xff] %v137_v33 }
 0x12e   :  { %308 = shalt.err (!%p305_p6)
}
 0x12f   :  { %s309_s10 = scalar_lea.hbm %s392_s2, 256 }
 0x130   :  { %p310_p7 = scmp.ne.s32.totalorder %s392_s2, %s309_s10  ;;  %p313_p8 = scmp.lt.u32.totalorder %s309_s10, %s392_s2 }
 0x132   :  { %p315_p9 = pnand %p313_p8, %p310_p7 }
 0x134   :  { %318 = shalt.err (!%p315_p9)
}
 0x135   :  { %152 = dma.vmem_to_hbm [thread:$0]  %s147_s6, 256, %s392_s2, [#allocation4], %s326_s19, %s326_s19, %s327_s20  }
 0x136   :  { %323 = dma.done.wait [#allocation4], 256  }
 0x137   :  { %324 = vsyncadd [#allocation4], 4294967040 }
 0x138   :  { %156 = vsyncpa [#allocation3], 1 }
 0x139   :  { %157 = vsyncpa [#allocation6], 1 }
 0x13a   :  { %158 = vsyncpa [#allocation4], 1 }

</bundles_post_ra>
